<compile_context>
chip_gen: v7x
topology: tpu7x:2x2x1
jax: 0.10.0
libtpu: 0.0.40
codegen_flags: <defaults>
</compile_context>

<pallas_src>
import functools

import jax
import jax.numpy as jnp
from jax.experimental import pallas as pl
from jax.experimental.pallas import tpu as pltpu


def _decode_kernel(pred_ref, out_ref, *, num_classes: int):
    # pred_ref: (1, F, TN) planar block (feature rows x anchors-on-lanes)
    # out_ref : (1, 6, TN) planar block (x1, y1, x2, y2, conf, class)
    p = pred_ref[0]                       # (F, TN) f32, lanes fully dense

    cx = p[0:1, :]
    cy = p[1:2, :]
    w = p[2:3, :]
    h = p[3:4, :]
    obj = p[4:5, :]

    # Unrolled max + argmax over class rows (VPU only, first-index tie-break).
    best = p[5:6, :]
    cls_idx = jnp.zeros_like(best)
    for c in range(1, num_classes):
        s = p[5 + c:6 + c, :]
        better = s > best                 # strict > keeps first index on ties
        cls_idx = jnp.where(better, jnp.float32(c), cls_idx)
        best = jnp.where(better, s, best)

    conf = obj * best

    hw = 0.5 * w
    hh = 0.5 * h
    x1 = jnp.clip(cx - hw, 0.0, 1.0)
    y1 = jnp.clip(cy - hh, 0.0, 1.0)
    x2 = jnp.clip(cx + hw, 0.0, 1.0)
    y2 = jnp.clip(cy + hh, 0.0, 1.0)

    # Six full-lane row stores (lane-dense output, no concatenate).
    out_ref[0, 0:1, :] = x1
    out_ref[0, 1:2, :] = y1
    out_ref[0, 2:3, :] = x2
    out_ref[0, 3:4, :] = y2
    out_ref[0, 4:5, :] = conf
    out_ref[0, 5:6, :] = cls_idx


def _pick_anchor_tile(n_padded: int) -> int:
    """Largest anchor tile (multiple of 128, <= 2048) dividing padded N."""
    for cand in (2048, 1024, 512, 256, 128):
        if n_padded % cand == 0:
            return cand
    return 128  # unreachable: n_padded is always a multiple of 128


def detection_post_prediction(preds: jax.Array) -> jax.Array:
    """preds: [B, N, 5+C] -> lane-dense decoded detections [B, 6, N] f32
    with rows (x1, y1, x2, y2, confidence, class)."""
    preds = preds.astype(jnp.float32)
    B, N, F = preds.shape
    assert F >= 6, "need at least (cx, cy, w, h, obj, 1 class score)"
    C = F - 5

    # Pad the anchor axis to a lane-friendly multiple of 128 (wrapper-side XLA
    # op; padding rows are discarded after the kernel).
    N_pad = ((N + 127) // 128) * 128
    TN = _pick_anchor_tile(N_pad)

    # Layout plumbing in the wrapper (XLA transpose), not in the kernel:
    # anchors go to the 128-lane axis.
    preds_planar = jnp.transpose(preds, (0, 2, 1))          # [B, F, N]
    if N_pad != N:
        preds_planar = jnp.pad(preds_planar,
                               ((0, 0), (0, 0), (0, N_pad - N)))

    kernel = functools.partial(_decode_kernel, num_classes=C)

    out = pl.pallas_call(
        kernel,
        out_shape=jax.ShapeDtypeStruct((B, 6, N_pad), jnp.float32),
        grid_spec=pltpu.PrefetchScalarGridSpec(
            num_scalar_prefetch=0,
            grid=(B, N_pad // TN),
            in_specs=[pl.BlockSpec((1, F, TN), lambda b, n: (b, 0, n))],
            out_specs=pl.BlockSpec((1, 6, TN), lambda b, n: (b, 0, n)),
        ),
        compiler_params=pltpu.CompilerParams(
            dimension_semantics=("parallel", "parallel"),
        ),
        cost_estimate=pl.CostEstimate(
            flops=B * N_pad * (10 + 2 * C),
            transcendentals=0,
            bytes_accessed=B * N_pad * (F + 6) * 4,
        ),
    )(preds_planar)

    if N_pad != N:
        out = out[:, :, :N]
    return out


def forward(preds: jax.Array):
    """Mirrors the callback contract: list of length batch_size, each item an
    (n x 6) array (x1, y1, x2, y2, confidence, class), x/y in [0, 1]."""
    decoded = detection_post_prediction(preds)        # [B, 6, N] lane-dense
    dets = jnp.transpose(decoded, (0, 2, 1))          # [B, N, 6] single transpose
    # One split for the list contract (not B individual device slices).
    return [d[0] for d in jnp.split(dets, dets.shape[0], axis=0)]


if __name__ == "__main__":
    key = jax.random.PRNGKey(0)
    B, N, C = 2, 512, 11                              # batch, anchors, classes
    F = 5 + C
    preds = jax.random.uniform(key, (B, N, F), dtype=jnp.float32)

    dets = forward(preds)
    for d in dets:
        jax.block_until_ready(d)
    out = jnp.stack(dets)                             # [B, N, 6]

    # Pure-JAX reference.
    p = preds
    ref_conf = p[..., 4] * jnp.max(p[..., 5:], axis=-1)
    ref_cls = jnp.argmax(p[..., 5:], axis=-1).astype(jnp.float32)
    ref_x1 = jnp.clip(p[..., 0] - 0.5 * p[..., 2], 0.0, 1.0)
    ref_y1 = jnp.clip(p[..., 1] - 0.5 * p[..., 3], 0.0, 1.0)
    ref_x2 = jnp.clip(p[..., 0] + 0.5 * p[..., 2], 0.0, 1.0)
    ref_y2 = jnp.clip(p[..., 1] + 0.5 * p[..., 3], 0.0, 1.0)

    assert out.shape == (B, N, 6)
    assert jnp.allclose(out[..., 0], ref_x1, atol=1e-6)
    assert jnp.allclose(out[..., 1], ref_y1, atol=1e-6)
    assert jnp.allclose(out[..., 2], ref_x2, atol=1e-6)
    assert jnp.allclose(out[..., 3], ref_y2, atol=1e-6)
    assert jnp.allclose(out[..., 4], ref_conf, atol=1e-6)
    assert jnp.array_equal(out[..., 5], ref_cls)

    print("KERNEL_OK")
</pallas_src>

<mosaic_0001>
module attributes {stable_mosaic.version = 11 : i64} {
  func.func @_decode_kernel(%arg0: i32, %arg1: i32, %arg2: memref<1x16x512xf32, #tpu.memory_space<vmem>>, %arg3: memref<1x6x512xf32, #tpu.memory_space<vmem>>) attributes {dimension_semantics = [#tpu.dimension_semantics<parallel>, #tpu.dimension_semantics<parallel>], iteration_bounds = array<i64: 2, 1>, scalar_prefetch = 0 : i64, scratch_operands = 0 : i64, tpu.core_type = #tpu.core_type<tc>, window_params = [{transform_indices = @transform_0, window_bounds = array<i64: 1, 16, 512>}, {transform_indices = @transform_1, window_bounds = array<i64: 1, 6, 512>}]} {
    %c0 = arith.constant 0 : index
    %c0_0 = arith.constant 0 : index
    %c0_1 = arith.constant 0 : index
    %0 = vector.load %arg2[%c0, %c0_0, %c0_1] : memref<1x16x512xf32, #tpu.memory_space<vmem>>, vector<1x16x512xf32>
    %1 = vector.shape_cast %0 : vector<1x16x512xf32> to vector<16x512xf32>
    %2 = vector.extract_strided_slice %1 {offsets = [0, 0], sizes = [1, 512], strides = [1, 1]} : vector<16x512xf32> to vector<1x512xf32>
    %3 = vector.extract_strided_slice %1 {offsets = [1, 0], sizes = [1, 512], strides = [1, 1]} : vector<16x512xf32> to vector<1x512xf32>
    %4 = vector.extract_strided_slice %1 {offsets = [2, 0], sizes = [1, 512], strides = [1, 1]} : vector<16x512xf32> to vector<1x512xf32>
    %5 = vector.extract_strided_slice %1 {offsets = [3, 0], sizes = [1, 512], strides = [1, 1]} : vector<16x512xf32> to vector<1x512xf32>
    %6 = vector.extract_strided_slice %1 {offsets = [4, 0], sizes = [1, 512], strides = [1, 1]} : vector<16x512xf32> to vector<1x512xf32>
    %7 = vector.extract_strided_slice %1 {offsets = [5, 0], sizes = [1, 512], strides = [1, 1]} : vector<16x512xf32> to vector<1x512xf32>
    %cst = arith.constant 0.000000e+00 : f32
    %8 = vector.broadcast %cst : f32 to vector<1x512xf32>
    %9 = vector.extract_strided_slice %1 {offsets = [6, 0], sizes = [1, 512], strides = [1, 1]} : vector<16x512xf32> to vector<1x512xf32>
    %10 = arith.cmpf ogt, %9, %7 : vector<1x512xf32>
    %cst_2 = arith.constant 1.000000e+00 : f32
    %11 = vector.broadcast %cst_2 : f32 to vector<1x512xf32>
    %12 = arith.select %10, %11, %8 : vector<1x512xi1>, vector<1x512xf32>
    %13 = arith.select %10, %9, %7 : vector<1x512xi1>, vector<1x512xf32>
    %14 = vector.extract_strided_slice %1 {offsets = [7, 0], sizes = [1, 512], strides = [1, 1]} : vector<16x512xf32> to vector<1x512xf32>
    %15 = arith.cmpf ogt, %14, %13 : vector<1x512xf32>
    %cst_3 = arith.constant 2.000000e+00 : f32
    %16 = vector.broadcast %cst_3 : f32 to vector<1x512xf32>
    %17 = arith.select %15, %16, %12 : vector<1x512xi1>, vector<1x512xf32>
    %18 = arith.select %15, %14, %13 : vector<1x512xi1>, vector<1x512xf32>
    %19 = vector.extract_strided_slice %1 {offsets = [8, 0], sizes = [1, 512], strides = [1, 1]} : vector<16x512xf32> to vector<1x512xf32>
    %20 = arith.cmpf ogt, %19, %18 : vector<1x512xf32>
    %cst_4 = arith.constant 3.000000e+00 : f32
    %21 = vector.broadcast %cst_4 : f32 to vector<1x512xf32>
    %22 = arith.select %20, %21, %17 : vector<1x512xi1>, vector<1x512xf32>
    %23 = arith.select %20, %19, %18 : vector<1x512xi1>, vector<1x512xf32>
    %24 = vector.extract_strided_slice %1 {offsets = [9, 0], sizes = [1, 512], strides = [1, 1]} : vector<16x512xf32> to vector<1x512xf32>
    %25 = arith.cmpf ogt, %24, %23 : vector<1x512xf32>
    %cst_5 = arith.constant 4.000000e+00 : f32
    %26 = vector.broadcast %cst_5 : f32 to vector<1x512xf32>
    %27 = arith.select %25, %26, %22 : vector<1x512xi1>, vector<1x512xf32>
    %28 = arith.select %25, %24, %23 : vector<1x512xi1>, vector<1x512xf32>
    %29 = vector.extract_strided_slice %1 {offsets = [10, 0], sizes = [1, 512], strides = [1, 1]} : vector<16x512xf32> to vector<1x512xf32>
    %30 = arith.cmpf ogt, %29, %28 : vector<1x512xf32>
    %cst_6 = arith.constant 5.000000e+00 : f32
    %31 = vector.broadcast %cst_6 : f32 to vector<1x512xf32>
    %32 = arith.select %30, %31, %27 : vector<1x512xi1>, vector<1x512xf32>
    %33 = arith.select %30, %29, %28 : vector<1x512xi1>, vector<1x512xf32>
    %34 = vector.extract_strided_slice %1 {offsets = [11, 0], sizes = [1, 512], strides = [1, 1]} : vector<16x512xf32> to vector<1x512xf32>
    %35 = arith.cmpf ogt, %34, %33 : vector<1x512xf32>
    %cst_7 = arith.constant 6.000000e+00 : f32
    %36 = vector.broadcast %cst_7 : f32 to vector<1x512xf32>
    %37 = arith.select %35, %36, %32 : vector<1x512xi1>, vector<1x512xf32>
    %38 = arith.select %35, %34, %33 : vector<1x512xi1>, vector<1x512xf32>
    %39 = vector.extract_strided_slice %1 {offsets = [12, 0], sizes = [1, 512], strides = [1, 1]} : vector<16x512xf32> to vector<1x512xf32>
    %40 = arith.cmpf ogt, %39, %38 : vector<1x512xf32>
    %cst_8 = arith.constant 7.000000e+00 : f32
    %41 = vector.broadcast %cst_8 : f32 to vector<1x512xf32>
    %42 = arith.select %40, %41, %37 : vector<1x512xi1>, vector<1x512xf32>
    %43 = arith.select %40, %39, %38 : vector<1x512xi1>, vector<1x512xf32>
    %44 = vector.extract_strided_slice %1 {offsets = [13, 0], sizes = [1, 512], strides = [1, 1]} : vector<16x512xf32> to vector<1x512xf32>
    %45 = arith.cmpf ogt, %44, %43 : vector<1x512xf32>
    %cst_9 = arith.constant 8.000000e+00 : f32
    %46 = vector.broadcast %cst_9 : f32 to vector<1x512xf32>
    %47 = arith.select %45, %46, %42 : vector<1x512xi1>, vector<1x512xf32>
    %48 = arith.select %45, %44, %43 : vector<1x512xi1>, vector<1x512xf32>
    %49 = vector.extract_strided_slice %1 {offsets = [14, 0], sizes = [1, 512], strides = [1, 1]} : vector<16x512xf32> to vector<1x512xf32>
    %50 = arith.cmpf ogt, %49, %48 : vector<1x512xf32>
    %cst_10 = arith.constant 9.000000e+00 : f32
    %51 = vector.broadcast %cst_10 : f32 to vector<1x512xf32>
    %52 = arith.select %50, %51, %47 : vector<1x512xi1>, vector<1x512xf32>
    %53 = arith.select %50, %49, %48 : vector<1x512xi1>, vector<1x512xf32>
    %54 = vector.extract_strided_slice %1 {offsets = [15, 0], sizes = [1, 512], strides = [1, 1]} : vector<16x512xf32> to vector<1x512xf32>
    %55 = arith.cmpf ogt, %54, %53 : vector<1x512xf32>
    %cst_11 = arith.constant 1.000000e+01 : f32
    %56 = vector.broadcast %cst_11 : f32 to vector<1x512xf32>
    %57 = arith.select %55, %56, %52 : vector<1x512xi1>, vector<1x512xf32>
    %58 = arith.select %55, %54, %53 : vector<1x512xi1>, vector<1x512xf32>
    %59 = arith.mulf %6, %58 : vector<1x512xf32>
    %cst_12 = arith.constant 5.000000e-01 : f32
    %60 = vector.broadcast %cst_12 : f32 to vector<1x512xf32>
    %61 = arith.mulf %60, %4 : vector<1x512xf32>
    %cst_13 = arith.constant 5.000000e-01 : f32
    %62 = vector.broadcast %cst_13 : f32 to vector<1x512xf32>
    %63 = arith.mulf %62, %5 : vector<1x512xf32>
    %64 = arith.subf %2, %61 : vector<1x512xf32>
    %cst_14 = arith.constant 0.000000e+00 : f32
    %cst_15 = arith.constant 1.000000e+00 : f32
    %65 = vector.broadcast %cst_14 : f32 to vector<1x512xf32>
    %66 = arith.maximumf %65, %64 : vector<1x512xf32>
    %67 = vector.broadcast %cst_15 : f32 to vector<1x512xf32>
    %68 = arith.minimumf %67, %66 : vector<1x512xf32>
    %69 = arith.subf %3, %63 : vector<1x512xf32>
    %cst_16 = arith.constant 0.000000e+00 : f32
    %cst_17 = arith.constant 1.000000e+00 : f32
    %70 = vector.broadcast %cst_16 : f32 to vector<1x512xf32>
    %71 = arith.maximumf %70, %69 : vector<1x512xf32>
    %72 = vector.broadcast %cst_17 : f32 to vector<1x512xf32>
    %73 = arith.minimumf %72, %71 : vector<1x512xf32>
    %74 = arith.addf %2, %61 : vector<1x512xf32>
    %cst_18 = arith.constant 0.000000e+00 : f32
    %cst_19 = arith.constant 1.000000e+00 : f32
    %75 = vector.broadcast %cst_18 : f32 to vector<1x512xf32>
    %76 = arith.maximumf %75, %74 : vector<1x512xf32>
    %77 = vector.broadcast %cst_19 : f32 to vector<1x512xf32>
    %78 = arith.minimumf %77, %76 : vector<1x512xf32>
    %79 = arith.addf %3, %63 : vector<1x512xf32>
    %cst_20 = arith.constant 0.000000e+00 : f32
    %cst_21 = arith.constant 1.000000e+00 : f32
    %80 = vector.broadcast %cst_20 : f32 to vector<1x512xf32>
    %81 = arith.maximumf %80, %79 : vector<1x512xf32>
    %82 = vector.broadcast %cst_21 : f32 to vector<1x512xf32>
    %83 = arith.minimumf %82, %81 : vector<1x512xf32>
    %c0_22 = arith.constant 0 : index
    %c0_23 = arith.constant 0 : index
    %c0_24 = arith.constant 0 : index
    %84 = vector.load %arg3[%c0_22, %c0_23, %c0_24] : memref<1x6x512xf32, #tpu.memory_space<vmem>>, vector<1x1x512xf32>
    %85 = vector.shape_cast %84 : vector<1x1x512xf32> to vector<1x512xf32>
    %86 = vector.shape_cast %68 : vector<1x512xf32> to vector<1x1x512xf32>
    tpu.vector_store %arg3[%c0_22, %c0_23, %c0_24], %86 {strides = array<i32>} : memref<1x6x512xf32, #tpu.memory_space<vmem>>, vector<1x1x512xf32>,
    %c0_25 = arith.constant 0 : index
    %c1 = arith.constant 1 : index
    %c0_26 = arith.constant 0 : index
    %87 = vector.load %arg3[%c0_25, %c1, %c0_26] : memref<1x6x512xf32, #tpu.memory_space<vmem>>, vector<1x1x512xf32>
    %88 = vector.shape_cast %87 : vector<1x1x512xf32> to vector<1x512xf32>
    %89 = vector.shape_cast %73 : vector<1x512xf32> to vector<1x1x512xf32>
    tpu.vector_store %arg3[%c0_25, %c1, %c0_26], %89 {strides = array<i32>} : memref<1x6x512xf32, #tpu.memory_space<vmem>>, vector<1x1x512xf32>,
    %c0_27 = arith.constant 0 : index
    %c2 = arith.constant 2 : index
    %c0_28 = arith.constant 0 : index
    %90 = vector.load %arg3[%c0_27, %c2, %c0_28] : memref<1x6x512xf32, #tpu.memory_space<vmem>>, vector<1x1x512xf32>
    %91 = vector.shape_cast %90 : vector<1x1x512xf32> to vector<1x512xf32>
    %92 = vector.shape_cast %78 : vector<1x512xf32> to vector<1x1x512xf32>
    tpu.vector_store %arg3[%c0_27, %c2, %c0_28], %92 {strides = array<i32>} : memref<1x6x512xf32, #tpu.memory_space<vmem>>, vector<1x1x512xf32>,
    %c0_29 = arith.constant 0 : index
    %c3 = arith.constant 3 : index
    %c0_30 = arith.constant 0 : index
    %93 = vector.load %arg3[%c0_29, %c3, %c0_30] : memref<1x6x512xf32, #tpu.memory_space<vmem>>, vector<1x1x512xf32>
    %94 = vector.shape_cast %93 : vector<1x1x512xf32> to vector<1x512xf32>
    %95 = vector.shape_cast %83 : vector<1x512xf32> to vector<1x1x512xf32>
    tpu.vector_store %arg3[%c0_29, %c3, %c0_30], %95 {strides = array<i32>} : memref<1x6x512xf32, #tpu.memory_space<vmem>>, vector<1x1x512xf32>,
    %c0_31 = arith.constant 0 : index
    %c4 = arith.constant 4 : index
    %c0_32 = arith.constant 0 : index
    %96 = vector.load %arg3[%c0_31, %c4, %c0_32] : memref<1x6x512xf32, #tpu.memory_space<vmem>>, vector<1x1x512xf32>
    %97 = vector.shape_cast %96 : vector<1x1x512xf32> to vector<1x512xf32>
    %98 = vector.shape_cast %59 : vector<1x512xf32> to vector<1x1x512xf32>
    tpu.vector_store %arg3[%c0_31, %c4, %c0_32], %98 {strides = array<i32>} : memref<1x6x512xf32, #tpu.memory_space<vmem>>, vector<1x1x512xf32>,
    %c0_33 = arith.constant 0 : index
    %c5 = arith.constant 5 : index
    %c0_34 = arith.constant 0 : index
    %99 = vector.load %arg3[%c0_33, %c5, %c0_34] : memref<1x6x512xf32, #tpu.memory_space<vmem>>, vector<1x1x512xf32>
    %100 = vector.shape_cast %99 : vector<1x1x512xf32> to vector<1x512xf32>
    %101 = vector.shape_cast %57 : vector<1x512xf32> to vector<1x1x512xf32>
    tpu.vector_store %arg3[%c0_33, %c5, %c0_34], %101 {strides = array<i32>} : memref<1x6x512xf32, #tpu.memory_space<vmem>>, vector<1x1x512xf32>,
    return
  }
  func.func @transform_0(%arg0: i32, %arg1: i32) -> (i32, i32, i32) {
    %c0_i32 = arith.constant 0 : i32
    %c0_i32_0 = arith.constant 0 : i32
    return %arg0, %c0_i32, %arg1 : i32, i32, i32
  }
  func.func @transform_1(%arg0: i32, %arg1: i32) -> (i32, i32, i32) {
    %c0_i32 = arith.constant 0 : i32
    %c0_i32_0 = arith.constant 0 : i32
    return %arg0, %c0_i32, %arg1 : i32, i32, i32
  }
}

</mosaic_0001>

<bundles_post_ra>
// kernel: tpu_custom_call.1
= control target key start
LH: loop header
LB: loop body
LE: loop exit
PB: predicated region body
PF: predicated region fallthrough
CT: control target
= control target key end

     0   :  { %6 = vsyncpa [#allocation3], 0  ;;  %s1619_s0 = inlined_call_operand.hbm [shape: f32[2,16,512], index: 0, kind: input, shape index: {}]   ;;  %s1620_s1 = inlined_call_operand.vmem [shape: f32[2,6,512], index: 1, kind: output, shape index: {}]  }
   0x1   :  { %8 = vsyncpa [#allocation3 + $0x1], 0  ;;  %s1004_s6 = smov 0   ;;  %s1006_s7 = smov 0  }
   0x2   :  { %s1008_s8 = smov 0   ;;  %s1010_s9 = smov 0  }
   0x3   :  { %s1012_s10 = smov 0   ;;  %s1014_s11 = smov 0  }
   0x4 LB: > { %s828_s12 = sadd.s32 4294967295, %s987_s11   ;;  %s26_s13 = sadd.s32 1, %s983_s10  ;;  %s987_s11 = sphi %s1014_s11, %s14_s11   ;;  %s983_s10 = sphi %s1012_s10, %s1733_s10   ;;  %s979_s9 = sphi %s1010_s9, %s1732_s9   ;;  %s975_s8 = sphi %s1008_s8, %s1731_s8   ;;  %s971_s7 = sphi %s1006_s7, %s1730_s7   ;;  %s967_s6 = sphi %s1004_s6, %s1729_s6  }
   0x5   : > { %p28_p0 = scmp.ge.s32.totalorder %s26_s13, 2  ;;  %s35_s14 = sadd.s32 1, %s975_s8 }
   0x6   : > { %p42_p1 = scmp.ne.s32.totalorder %s975_s8, %s971_s7  ;;  %p43_p2 = scmp.eq.s32.totalorder %s987_s11, 0 }
   0x7   : > { %s1735_s13 = smov (%p28_p0, %s26_s13), 0  ;;  %p48_p4 = scmp.ne.s32.totalorder %s971_s7, %s967_s6 }
   0x8   : > { %p1040_p3 = por %p43_p2, %p42_p1  ;;  %s30_s16 = ssub.s32 %s983_s10, %s1735_s13 }
   0x9   : > { %p49_p5 = scmp.eq.s32.totalorder %s828_s12, 0  ;;  %p33_p6 = scmp.eq.s32.totalorder %s30_s16, 0 }
   0xa   : > { %p854_p8 = scmp.lt.s32.totalorder %s987_s11, 2  ;;  %s100_s19 = sand.u32 1, %s975_s8  }
   0xb   : > { %p1047_p7 = por %p49_p5, %p48_p4  ;;  %s846_s20 = sshll.u32 %s983_s10, 10 }
   0xc   : > { %s1053_s18 = scalar_select %p33_p6, %s975_s8, %s35_s14  }
   0xd   : > { %s832_s21 = sshll.u32 %s100_s19, 6  ;;  %s1060_s24 = scalar_lea.hbm %s1619_s0, %s846_s20 }
   0xe   : > { %s104_s25 = scalar_lea.vmem [#allocation2], %s832_s21  ;;  %p1064_p9 = pnand %p854_p8, %p1040_p3 }
   0xf   : > { %s113_s26 = sshll.u32 %s104_s25, 4  ;;  %s1070_s28 = scalar_lea.sflag [#allocation3], %s100_s19  ;;  %s1068_s26 = int_to_ptr.vmem [resolvable:$true] %s113_s26 }
  0x10   : > { %s907_s29 = scalar_lea.hbm %s1060_s24, 1024  ;;  %p909_p11 = pneg %p1064_p9 }
  0x11   : > { %p908_p10 = scmp.ne.s32.totalorder %s1060_s24, %s907_s29  ;;  %s912_s3 = scalar_lea.hbm %s1619_s0, 2048 }
  0x12   : > { %p913_p0 = scmp.lt.u32.totalorder %s1060_s24, %s1619_s0  ;;  %p914_p1 = scmp.lt.u32.totalorder %s912_s3, %s907_s29 }
  0x13   : > { %p910_p12 = pnand %p909_p11, %p908_p10  ;;  %p916_p3 = scmp.lt.u32.totalorder %s907_s29, %s1060_s24 }
  0x14   : > { %p915_p2 = por %p914_p1, %p913_p0 }
  0x15   : > { %p911_p13 = pneg %p910_p12 }
  0x16   : > { %p917_p4 = por %p916_p3, %p915_p2 }
  0x18   : > { %p918_p5 = pnand %p917_p4, %p911_p13 }
  0x1a   : > { %921 = shalt.err (!%p918_p5)
}
  0x1b   : > { %s922_s6 = scalar_lea.vmem %s1068_s26, 1024  ;;  %s989_s12 = smov [#allocation2]  }
  0x1c   : > { %p923_p6 = scmp.ne.s32.totalorder %s1068_s26, %s922_s6  ;;  %s927_s14 = sshll.u32 %s989_s12, 4  ;;  %s928_s14 = int_to_ptr.vmem [resolvable:$false] %s927_s14 }
  0x1d   : > { %s929_s15 = scalar_lea.vmem %s928_s14, 2048  ;;  %p930_p12 = scmp.lt.s32.totalorder %s1068_s26, %s928_s14 }
  0x1e   : > { %p925_p8 = pnand %p923_p6, %p909_p11  ;;  %p931_p0 = scmp.lt.s32.totalorder %s929_s15, %s922_s6 }
  0x20   : > { %p926_p10 = pneg %p925_p8  ;;  %p932_p1 = por %p931_p0, %p930_p12 }
  0x22   : > { %p933_p2 = pnand %p932_p1, %p926_p10 }
  0x24   : > { %936 = shalt.err (!%p933_p2)
}
  0x25   : > { %s990_s16 = smov 512   ;;  %s991_s19 = smov 32  }
  0x26   : > { %853 = dma.hbm_to_vmem [thread:$0]  (!%p1064_p9), %s1060_s24, 1024, %s1068_s26, %s1070_s28, %s990_s16, %s990_s16, %s991_s19  }
  0x27   : > { %p835_p11 = scmp.ge.s32.totalorder %s987_s11, 1  ;;  %p121_p13 = scmp.lt.s32.totalorder %s987_s11, 3 }
  0x29   : > { %p122_p3 = pnand %p835_p11, %p121_p13 }
  0x2a   : > { %s127_s20 = sand.u32 (!%p122_p3), 1, %s971_s7  }
  0x2b   : > { %125 = sbr.rel (%p122_p3) target bundleno = 141 (0x8d), region = 24  ;;  %s836_s21 = sshll.u32 (!%p122_p3), %s127_s20, 6 }
  0x2c   : > { %s128_s22 = scalar_lea.sflag (!%p122_p3), [#allocation3], %s127_s20  ;;  %s1101_s23 = scalar_lea.vmem (!%p122_p3), [#allocation2], %s836_s21 }
  0x32   : > { %962 = dma.done.wait (%p1047_p7), %s128_s22, 1024  }
  0x33   : > { %964 = vsyncadd (%p1047_p7), %s128_s22, 4294966272  ;;  %v586_v0 = vlaneseq  ;;  %v992_v1 = vmov 1966171168   ;;  %v1108_v5 = vld [vmem:[%s1101_s23] sm:$0xff]  ;;  %v1111_v6 = vld [vmem:[%s1101_s23 + $0x8] sm:$0xff]  ;;  %p156_p7 = scmp.lt.s32.totalorder %s979_s9, 1 }
  0x34   : > { %v584_v2 = vunpack.c.l.s4 %v992_v1  ;;  %v1114_v7 = vld [vmem:[%s1101_s23 + $0x10] sm:$0xff]  ;;  %v1119_v9 = vld [vmem:[%s1101_s23 + $0x18] sm:$0xff]  ;;  %v177_v10 = vrot.slane %v1108_v5, 7  ;;  %v178_v11 = vrot.slane %v1111_v6, 7  ;;  %v537_v13 = vmul.f32 0.5, %v1108_v5 }
  0x35   : > { %v587_v4 = vshrl.u32 %v586_v0, 7  ;;  %v179_v12 = vrot.slane %v1114_v7, 7  ;;  %v180_v14 = vrot.slane %v1119_v9, 7  ;;  %v538_v15 = vmul.f32 0.5, %v1111_v6  ;;  %s1737_s9 = smov (!%p156_p7, %s979_s9), 1 }
  0x36   : > { %v585_v3 = vunpack.c.0.s8 %v584_v2  ;;  %v539_v16 = vmul.f32 0.5, %v1114_v7  ;;  %v540_v17 = vmul.f32 0.5, %v1119_v9  ;;  %vm1130_vm0 = vcmp.gt.f32.partialorder %v1108_v5, %v177_v10  ;;  %s847_s17 = sshll.u32 %s1737_s9, 5 }
  0x37   : > { %vm1135_vm1 = vcmp.gt.f32.partialorder %v1111_v6, %v178_v11  ;;  %vm1140_vm2 = vcmp.gt.f32.partialorder %v1114_v7, %v179_v12  ;;  %v545_v21 = vrot.slane %v537_v13, 2  ;;  %vm1145_vm3 = vcmp.gt.f32.partialorder %v1119_v9, %v180_v14  ;;  %s1238_s25 = scalar_lea.vmem %s1620_s1, %s847_s17 }
  0x38   : > { %v1116_v8 = vsub.s32 %v585_v3, %v587_v4  ;;  %v193_v23 = vsel %vm1130_vm0, %v1108_v5, %v177_v10  ;;  %v194_v24 = vsel %vm1135_vm1, %v1111_v6, %v178_v11  ;;  %v195_v25 = vsel %vm1140_vm2, %v1114_v7, %v179_v12  ;;  %v1203_v4 = vld [vmem:[%s1101_s23 + $0x20] sm:$0xff] }
  0x39   : > { %v196_v26 = vsel %vm1145_vm3, %v1119_v9, %v180_v14  ;;  %v201_v27 = vrot.slane %v193_v23, 7  ;;  %v202_v28 = vrot.slane %v194_v24, 7  ;;  %v203_v29 = vrot.slane %v195_v25, 7  ;;  %v1226_v24 = vld [vmem:[%s1101_s23 + $0x38] sm:$0xff] }
  0x3a   : > { %v204_v30 = vrot.slane %v196_v26, 7  ;;  %v546_v31 = vrot.slane %v538_v15, 2  ;;  %v547_v32 = vrot.slane %v539_v16, 2  ;;  %v548_v33 = vrot.slane %v540_v17, 2  ;;  %v1219_v16 = vld [vmem:[%s1101_s23 + $0x28] sm:$0xff]  ;;  %v1222_v17 = vld [vmem:[%s1101_s23 + $0x30] sm:$0xff] }
  0x3b   : > { %v553_v34 = vsub.f32 %v1108_v5, %v545_v21  ;;  %v565_v35 = vadd.f32 %v545_v21, %v1108_v5  ;;  %vm1164_vm4 = vcmp.gt.f32.partialorder %v1108_v5, %v201_v27  ;;  %vm1169_vm5 = vcmp.gt.f32.partialorder %v1111_v6, %v202_v28 }
  0x3c   : > { %v554_v38 = vsub.f32 %v1111_v6, %v546_v31  ;;  %v555_v39 = vsub.f32 %v1114_v7, %v547_v32  ;;  %v556_v40 = vsub.f32 %v1119_v9, %v548_v33  ;;  %v566_v41 = vadd.f32 %v546_v31, %v1111_v6 }
  0x3d   : > { %v557_v42 = vmax.f32 %v553_v34, 0.0  ;;  %v567_v43 = vadd.f32 %v547_v32, %v1114_v7  ;;  %v568_v44 = vadd.f32 %v548_v33, %v1119_v9  ;;  %v569_v45 = vmax.f32 %v565_v35, 0.0 }
  0x3e   : > { %v558_v46 = vmax.f32 %v554_v38, 0.0  ;;  %v559_v47 = vmax.f32 %v555_v39, 0.0  ;;  %v560_v48 = vmax.f32 %v556_v40, 0.0  ;;  %v570_v49 = vmax.f32 %v566_v41, 0.0 }
  0x3f   : > { %v561_v50 = vmin.f32 %v557_v42, 1.0  ;;  %vm1180_vm6 = vcmp.lt.s32.totalorder %v586_v0, 512  ;;  %v1648_v51 = vmov 0  ;;  %v571_v52 = vmax.f32 %v567_v43, 0.0 }
  0x40   : > { %v1649_v51 = vsel %vm1180_vm6, 4294967295, %v1648_v51  ;;  %v572_v53 = vmax.f32 %v568_v44, 0.0  ;;  %v573_v54 = vmin.f32 %v569_v45, 1.0  ;;  %v562_v55 = vmin.f32 %v558_v46, 1.0 }
  0x41   : > { %v563_v56 = vmin.f32 %v559_v47, 1.0  ;;  %v564_v57 = vmin.f32 %v560_v48, 1.0  ;;  %v574_v58 = vmin.f32 %v570_v49, 1.0  ;;  %v575_v59 = vmin.f32 %v571_v52, 1.0 }
  0x42   : > { %v576_v60 = vmin.f32 %v572_v53, 1.0  ;;  %vm1190_vm7 = vcmp.gt.f32.partialorder %v1114_v7, %v203_v29  ;;  %vm1195_vm8 = vcmp.gt.f32.partialorder %v1119_v9, %v204_v30  ;;  %v581_v63 = vcombine.low %v561_v50, %v562_v55 }
  0x43   : > { %v582_v0 = vcombine.low %v563_v56, %v564_v57  ;;  %v628_v1 = vcombine.low %v573_v54, %v574_v58  ;;  %v229_v2 = vsel %vm1164_vm4, %v1108_v5, %v201_v27  ;;  %v230_v10 = vsel %vm1169_vm5, %v1111_v6, %v202_v28 }
  0x44   : > { %v629_v3 = vcombine.low %v575_v59, %v576_v60  ;;  %v231_v11 = vsel %vm1190_vm7, %v1114_v7, %v203_v29  ;;  %v232_v12 = vsel %vm1195_vm8, %v1119_v9, %v204_v30  ;;  %v589_v13 = vrot.slane %v581_v63, %v1116_v8 }
  0x45   : > { %v596_v14 = vrot.slane %v582_v0, %v1116_v8  ;;  %v636_v15 = vrot.slane %v628_v1, %v1116_v8  ;;  %v237_v21 = vrot.slane %v229_v2, 7  ;;  %v238_v25 = vrot.slane %v230_v10, 7 }
  0x46   : > { %v643_v23 = vrot.slane %v629_v3, %v1116_v8  ;;  %v239_v26 = vrot.slane %v231_v11, 7  ;;  %v240_v27 = vrot.slane %v232_v12, 7  ;;  %v993_v31 = vmov 0.0  }
  0x47   : > { %v597_v28 = vcombine.low %v589_v13, %v596_v14  ;;  %v612_v29 = vcombine.high %v589_v13, %v596_v14  ;;  %vm1229_vm9 = vcmp.gt.f32.partialorder %v1203_v4, %v237_v21  ;;  %v189_v32 = vsel %vm1130_vm0, 1.0, %v993_v31 }
  0x48   : > { %v644_v33 = vcombine.low %v636_v15, %v643_v23  ;;  %v656_v34 = vcombine.high %v636_v15, %v643_v23  ;;  %vm1241_vm10 = vcmp.gt.f32.partialorder %v1219_v16, %v238_v25  ;;  %vm1246_vm11 = vcmp.gt.f32.partialorder %v1222_v17, %v239_v26 }
  0x49   : > { %v604_v18 = vrot.slane %v597_v28, %v1116_v8  ;;  %v619_v39 = vrot.slane %v612_v29, %v1116_v8  ;;  %vm1253_vm12 = vcmp.gt.f32.partialorder %v1226_v24, %v240_v27  ;;  %v265_v41 = vsel %vm1229_vm9, %v1203_v4, %v237_v21 }
  0x4a   : > { %v651_v42 = vrot.slane %v644_v33, %v1116_v8  ;;  %v663_v43 = vrot.slane %v656_v34, %v1116_v8  ;;  %v266_v44 = vsel %vm1241_vm10, %v1219_v16, %v238_v25  ;;  %v267_v45 = vsel %vm1246_vm11, %v1222_v17, %v239_v26 }
  0x4b   : > { %610 = vst.msk [vmem:[%s1238_s25] ss:$8 sm:$0xf] %vm1180_vm6, %v604_v18  ;;  %839 = vst.msk [vmem:[%s1238_s25 + $0x1] ss:$8 sm:$0xf] %vm1180_vm6, %v619_v39  ;;  %v268_v46 = vsel %vm1253_vm12, %v1226_v24, %v240_v27 }
  0x4c   : > { %v273_v47 = vrot.slane %v265_v41, 7  ;;  %v274_v48 = vrot.slane %v266_v44, 7  ;;  %v275_v49 = vrot.slane %v267_v45, 7  ;;  %840 = vst.msk [vmem:[%s1238_s25 + $0x2] ss:$8 sm:$0xf] %vm1180_vm6, %v651_v42 }
  0x4d   : > { %841 = vst.msk [vmem:[%s1238_s25 + $0x3] ss:$8 sm:$0xf] %vm1180_vm6, %v663_v43  ;;  %v276_v50 = vrot.slane %v268_v46, 7  ;;  %v190_v52 = vsel %vm1135_vm1, 1.0, %v993_v31  ;;  %v191_v53 = vsel %vm1140_vm2, 1.0, %v993_v31 }
  0x4e   : > { %v192_v54 = vsel %vm1145_vm3, 1.0, %v993_v31  ;;  %vm1290_vm13 = vcmp.gt.f32.partialorder %v1203_v4, %v273_v47  ;;  %vm1295_vm14 = vcmp.gt.f32.partialorder %v1219_v16, %v274_v48  ;;  %vm1300_vm15 = vcmp.gt.f32.partialorder %v1222_v17, %v275_v49 }
  0x4f   : > { %v217_v20 = vrot.slane %v189_v32, 7  ;;  %vm1305_vm0 = vcmp.gt.f32.partialorder %v1226_v24, %v276_v50  ;;  %v301_v57 = vsel %vm1290_vm13, %v1203_v4, %v273_v47  ;;  %v302_v58 = vsel %vm1295_vm14, %v1219_v16, %v274_v48 }
  0x50   : > { %v303_v59 = vsel %vm1300_vm15, %v1222_v17, %v275_v49  ;;  %v304_v60 = vsel %vm1305_vm0, %v1226_v24, %v276_v50  ;;  %v309_v63 = vrot.slane %v301_v57, 7  ;;  %v310_v0 = vrot.slane %v302_v58, 7 }
  0x51   : > { %v311_v1 = vrot.slane %v303_v59, 7  ;;  %v312_v2 = vrot.slane %v304_v60, 7  ;;  %v218_v3 = vrot.slane %v190_v52, 7  ;;  %v219_v10 = vrot.slane %v191_v53, 7 }
  0x52   : > { %v220_v11 = vrot.slane %v192_v54, 7  ;;  %vm1322_vm1 = vcmp.gt.f32.partialorder %v1203_v4, %v309_v63  ;;  %vm1327_vm2 = vcmp.gt.f32.partialorder %v1219_v16, %v310_v0  ;;  %v1674_v14 = vmov 0 }
  0x53   : > { %vm1332_vm3 = vcmp.gt.f32.partialorder %v1222_v17, %v311_v1  ;;  %v225_v15 = vsel %vm1164_vm4, 2.0, %v217_v20  ;;  %vm1339_vm6 = vcmp.gt.f32.partialorder %v1226_v24, %v312_v2  ;;  %v1676_v21 = vmov 0 }
  0x54   : > { %v1675_v14 = vsel %vm1332_vm3, 4294967295, %v1674_v14  ;;  %v1677_v21 = vsel %vm1339_vm6, 4294967295, %v1676_v21  ;;  %v337_v23 = vsel %vm1322_vm1, %v1203_v4, %v309_v63  ;;  %v338_v25 = vsel %vm1327_vm2, %v1219_v16, %v310_v0 }
  0x55   : > { %v339_v26 = vsel %vm1332_vm3, %v1222_v17, %v311_v1  ;;  %v340_v36 = vsel %vm1339_vm6, %v1226_v24, %v312_v2  ;;  %v345_v27 = vrot.slane %v337_v23, 7  ;;  %v346_v28 = vrot.slane %v338_v25, 7 }
  0x56   : > { %v347_v29 = vrot.slane %v339_v26, 7  ;;  %v348_v31 = vrot.slane %v340_v36, 7  ;;  %v226_v32 = vsel %vm1169_vm5, 2.0, %v218_v3  ;;  %v227_v33 = vsel %vm1190_vm7, 2.0, %v219_v10 }
  0x57   : > { %v228_v34 = vsel %vm1195_vm8, 2.0, %v220_v11  ;;  %vm1362_vm4 = vcmp.gt.f32.partialorder %v1203_v4, %v345_v27  ;;  %vm1367_vm6 = vcmp.gt.f32.partialorder %v1219_v16, %v346_v28  ;;  %v1682_v37 = vmov 0 }
  0x58   : > { %vm1372_vm3 = vcmp.gt.f32.partialorder %v1222_v17, %v347_v29  ;;  %v253_v61 = vrot.slane %v225_v15, 7  ;;  %vm1377_vm5 = vcmp.gt.f32.partialorder %v1226_v24, %v348_v31  ;;  %v1684_v62 = vmov 0 }
  0x59   : > { %v1683_v37 = vsel %vm1372_vm3, 4294967295, %v1682_v37  ;;  %v1685_v62 = vsel %vm1377_vm5, 4294967295, %v1684_v62  ;;  %v373_v41 = vsel %vm1362_vm4, %v1203_v4, %v345_v27  ;;  %v374_v42 = vsel %vm1367_vm6, %v1219_v16, %v346_v28 }
  0x5a   : > { %v375_v43 = vsel %vm1372_vm3, %v1222_v17, %v347_v29  ;;  %v376_v44 = vsel %vm1377_vm5, %v1226_v24, %v348_v31  ;;  %v381_v45 = vrot.slane %v373_v41, 7  ;;  %v382_v46 = vrot.slane %v374_v42, 7 }
  0x5b   : > { %v383_v47 = vrot.slane %v375_v43, 7  ;;  %v384_v48 = vrot.slane %v376_v44, 7  ;;  %v254_v49 = vrot.slane %v226_v32, 7  ;;  %v255_v50 = vrot.slane %v227_v33, 7 }
  0x5c   : > { %v256_v52 = vrot.slane %v228_v34, 7  ;;  %vm1394_vm7 = vcmp.gt.f32.partialorder %v1203_v4, %v381_v45  ;;  %vm1399_vm8 = vcmp.gt.f32.partialorder %v1219_v16, %v382_v46  ;;  %v1690_v20 = vmov 0 }
  0x5d   : > { %vm1404_vm3 = vcmp.gt.f32.partialorder %v1222_v17, %v383_v47  ;;  %v261_v57 = vsel %vm1229_vm9, 3.0, %v253_v61  ;;  %vm1411_vm5 = vcmp.gt.f32.partialorder %v1226_v24, %v384_v48  ;;  %v1692_v58 = vmov 0 }
  0x5e   : > { %v1691_v20 = vsel %vm1404_vm3, 4294967295, %v1690_v20  ;;  %v1693_v58 = vsel %vm1411_vm5, 4294967295, %v1692_v58  ;;  %v409_v59 = vsel %vm1394_vm7, %v1203_v4, %v381_v45  ;;  %v410_v60 = vsel %vm1399_vm8, %v1219_v16, %v382_v46 }
  0x5f   : > { %v411_v63 = vsel %vm1404_vm3, %v1222_v17, %v383_v47  ;;  %v412_v30 = vsel %vm1411_vm5, %v1226_v24, %v384_v48  ;;  %v417_v0 = vrot.slane %v409_v59, 7  ;;  %v418_v1 = vrot.slane %v410_v60, 7 }
  0x60   : > { %v419_v2 = vrot.slane %v411_v63, 7  ;;  %v420_v3 = vrot.slane %v412_v30, 7  ;;  %v262_v10 = vsel %vm1241_vm10, 3.0, %v254_v49  ;;  %v263_v11 = vsel %vm1246_vm11, 3.0, %v255_v50 }
  0x61   : > { %v264_v15 = vsel %vm1253_vm12, 3.0, %v256_v52  ;;  %vm1434_vm9 = vcmp.gt.f32.partialorder %v1203_v4, %v417_v0  ;;  %vm1439_vm5 = vcmp.gt.f32.partialorder %v1219_v16, %v418_v1  ;;  %v1698_v35 = vmov 0 }
  0x62   : > { %vm1444_vm3 = vcmp.gt.f32.partialorder %v1222_v17, %v419_v2  ;;  %v289_v38 = vrot.slane %v261_v57, 7  ;;  %vm1449_vm10 = vcmp.gt.f32.partialorder %v1226_v24, %v420_v3  ;;  %v1700_v40 = vmov 0 }
  0x63   : > { %v1699_v35 = vsel %vm1444_vm3, 4294967295, %v1698_v35  ;;  %v1701_v40 = vsel %vm1449_vm10, 4294967295, %v1700_v40  ;;  %v445_v26 = vsel %vm1434_vm9, %v1203_v4, %v417_v0  ;;  %v446_v36 = vsel %vm1439_vm5, %v1219_v16, %v418_v1 }
  0x64   : > { %v447_v27 = vsel %vm1444_vm3, %v1222_v17, %v419_v2  ;;  %v448_v28 = vsel %vm1449_vm10, %v1226_v24, %v420_v3  ;;  %v453_v29 = vrot.slane %v445_v26, 7  ;;  %v454_v31 = vrot.slane %v446_v36, 7 }
  0x65   : > { %v455_v32 = vrot.slane %v447_v27, 7  ;;  %v456_v33 = vrot.slane %v448_v28, 7  ;;  %v290_v34 = vrot.slane %v262_v10, 7  ;;  %v291_v61 = vrot.slane %v263_v11, 7 }
  0x66   : > { %v292_v41 = vrot.slane %v264_v15, 7  ;;  %vm1466_vm11 = vcmp.gt.f32.partialorder %v1203_v4, %v453_v29  ;;  %vm1471_vm12 = vcmp.gt.f32.partialorder %v1219_v16, %v454_v31  ;;  %v1706_v44 = vmov 0 }
  0x67   : > { %vm1476_vm3 = vcmp.gt.f32.partialorder %v1222_v17, %v455_v32  ;;  %v297_v45 = vsel %vm1290_vm13, 4.0, %v289_v38  ;;  %vm1483_vm10 = vcmp.gt.f32.partialorder %v1226_v24, %v456_v33  ;;  %v1708_v46 = vmov 0 }
  0x68   : > { %v1707_v44 = vsel %vm1476_vm3, 4294967295, %v1706_v44  ;;  %v1709_v46 = vsel %vm1483_vm10, 4294967295, %v1708_v46  ;;  %v481_v47 = vsel %vm1466_vm11, %v1203_v4, %v453_v29  ;;  %v482_v48 = vsel %vm1471_vm12, %v1219_v16, %v454_v31 }
  0x69   : > { %v483_v49 = vsel %vm1476_vm3, %v1222_v17, %v455_v32  ;;  %v484_v55 = vsel %vm1483_vm10, %v1226_v24, %v456_v33  ;;  %v489_v50 = vrot.slane %v481_v47, 7  ;;  %v490_v52 = vrot.slane %v482_v48, 7 }
  0x6a   : > { %v491_v57 = vrot.slane %v483_v49, 7  ;;  %v492_v59 = vrot.slane %v484_v55, 7  ;;  %v298_v60 = vsel %vm1295_vm14, 4.0, %v290_v34  ;;  %v299_v63 = vsel %vm1300_vm15, 4.0, %v291_v61 }
  0x6b   : > { %v300_v30 = vsel %vm1305_vm0, 4.0, %v292_v41  ;;  %vm1506_vm13 = vcmp.gt.f32.partialorder %v1203_v4, %v489_v50  ;;  %vm1511_vm10 = vcmp.gt.f32.partialorder %v1219_v16, %v490_v52  ;;  %v325_v19 = vrot.slane %v297_v45, 7 }
  0x6c   : > { %vm1516_vm3 = vcmp.gt.f32.partialorder %v1222_v17, %v491_v57  ;;  %vm1521_vm14 = vcmp.gt.f32.partialorder %v1226_v24, %v492_v59  ;;  %v517_v2 = vsel %vm1506_vm13, %v1203_v4, %v489_v50  ;;  %v518_v3 = vsel %vm1511_vm10, %v1219_v16, %v490_v52 }
  0x6d   : > { %v519_v10 = vsel %vm1516_vm3, %v1222_v17, %v491_v57  ;;  %v520_v11 = vsel %vm1521_vm14, %v1226_v24, %v492_v59  ;;  %v525_v15 = vrot.slane %v517_v2, 3  ;;  %v526_v38 = vrot.slane %v518_v3, 3 }
  0x6e   : > { %v527_v26 = vrot.slane %v519_v10, 3  ;;  %v528_v36 = vrot.slane %v520_v11, 3  ;;  %v326_v27 = vrot.slane %v298_v60, 7  ;;  %v327_v28 = vrot.slane %v299_v63, 7 }
  0x6f   : > { %v328_v29 = vrot.slane %v300_v30, 7  ;;  %v533_v4 = vmul.f32 %v525_v15, %v1108_v5  ;;  %v534_v31 = vmul.f32 %v526_v38, %v1111_v6  ;;  %v333_v17 = vsel %vm1322_vm1, 5.0, %v325_v19 }
  0x70   : > { %v535_v16 = vmul.f32 %v527_v26, %v1114_v7  ;;  %v536_v32 = vmul.f32 %v528_v36, %v1119_v9  ;;  %v334_v24 = vsel %vm1327_vm2, 5.0, %v326_v27  ;;  %vm1718_vm15 = vnez %v1675_v14 }
  0x71   : > { %v335_v33 = vsel %vm1718_vm15, 5.0, %v327_v28  ;;  %vm1719_vm0 = vnez %v1677_v21  ;;  %v672_v61 = vcombine.high %v533_v4, %v534_v31  ;;  %v361_v5 = vrot.slane %v333_v17, 7 }
  0x72   : > { %v336_v34 = vsel %vm1719_vm0, 5.0, %v328_v29  ;;  %v362_v41 = vrot.slane %v334_v24, 7  ;;  %v363_v6 = vrot.slane %v335_v33, 7  ;;  %v673_v45 = vcombine.high %v535_v16, %v536_v32 }
  0x73   : > { %v364_v7 = vrot.slane %v336_v34, 7  ;;  %v680_v12 = vrot.slane %v672_v61, %v1116_v8  ;;  %v369_v9 = vsel %vm1362_vm4, 6.0, %v361_v5  ;;  %vm1720_vm1 = vnez %v1683_v37 }
  0x74   : > { %v370_v13 = vsel %vm1367_vm6, 6.0, %v362_v41  ;;  %v371_v14 = vsel %vm1720_vm1, 6.0, %v363_v6  ;;  %v687_v21 = vrot.slane %v673_v45, %v1116_v8  ;;  %vm1721_vm2 = vnez %v1685_v62 }
  0x75   : > { %v372_v47 = vsel %vm1721_vm2, 6.0, %v364_v7  ;;  %v397_v48 = vrot.slane %v369_v9, 7  ;;  %v398_v49 = vrot.slane %v370_v13, 7  ;;  %v399_v55 = vrot.slane %v371_v14, 7 }
  0x76   : > { %v400_v50 = vrot.slane %v372_v47, 7  ;;  %v688_v52 = vcombine.low %v680_v12, %v687_v21  ;;  %vm1722_vm6 = vnez %v1691_v20  ;;  %vm1723_vm4 = vnez %v1693_v58 }
  0x77   : > { %v405_v18 = vsel %vm1394_vm7, 7.0, %v397_v48  ;;  %v406_v39 = vsel %vm1399_vm8, 7.0, %v398_v49  ;;  %v407_v37 = vsel %vm1722_vm6, 7.0, %v399_v55  ;;  %vm1724_vm7 = vnez %v1649_v51 }
  0x78   : > { %v408_v57 = vsel %vm1723_vm4, 7.0, %v400_v50  ;;  %v433_v62 = vrot.slane %v405_v18, 7  ;;  %v434_v59 = vrot.slane %v406_v39, 7  ;;  %v695_v60 = vrot.slane %v688_v52, %v1116_v8 }
  0x79   : > { %v435_v63 = vrot.slane %v407_v37, 7  ;;  %v436_v30 = vrot.slane %v408_v57, 7  ;;  %vm1725_vm8 = vnez %v1699_v35  ;;  %vm1726_vm15 = vnez %v1701_v40 }
  0x7a   : > { %v441_v19 = vsel %vm1434_vm9, 8.0, %v433_v62  ;;  %v442_v53 = vsel %vm1439_vm5, 8.0, %v434_v59  ;;  %842 = vst.msk [vmem:[%s1238_s25 + $0x4] ss:$8 sm:$0xf] %vm1724_vm7, %v695_v60  ;;  %vm1727_vm5 = vnez %v1707_v44  ;;  %vm1728_vm9 = vnez %v1709_v46 }
  0x7b   : > { %v443_v54 = vsel %vm1725_vm8, 8.0, %v435_v63  ;;  %v444_v20 = vsel %vm1726_vm15, 8.0, %v436_v30  ;;  %v469_v58 = vrot.slane %v441_v19, 7  ;;  %v470_v2 = vrot.slane %v442_v53, 7 }
  0x7c   : > { %v471_v3 = vrot.slane %v443_v54, 7  ;;  %v472_v10 = vrot.slane %v444_v20, 7 }
  0x7d   : > { %v477_v23 = vsel %vm1466_vm11, 9.0, %v469_v58  ;;  %v478_v25 = vsel %vm1471_vm12, 9.0, %v470_v2 }
  0x7e   : > { %v479_v11 = vsel %vm1727_vm5, 9.0, %v471_v3  ;;  %v480_v35 = vsel %vm1728_vm9, 9.0, %v472_v10  ;;  %v505_v15 = vrot.slane %v477_v23, 7  ;;  %v506_v40 = vrot.slane %v478_v25, 7 }
  0x7f   : > { %v507_v38 = vrot.slane %v479_v11, 7  ;;  %v508_v26 = vrot.slane %v480_v35, 7 }
  0x80   : > { %v513_v36 = vsel %vm1506_vm13, 10.0, %v505_v15  ;;  %v514_v42 = vsel %vm1511_vm10, 10.0, %v506_v40 }
  0x81   : > { %v515_v43 = vsel %vm1516_vm3, 10.0, %v507_v38  ;;  %v516_v44 = vsel %vm1521_vm14, 10.0, %v508_v26  ;;  %v704_v27 = vcombine.high %v513_v36, %v514_v42 }
  0x82   : > { %v705_v46 = vcombine.high %v515_v43, %v516_v44 }
  0x83   : > { %v712_v28 = vrot.slane %v704_v27, %v1116_v8 }
  0x84   : > { %v719_v29 = vrot.slane %v705_v46, %v1116_v8 }
  0x86   : > { %v720_v4 = vcombine.high %v712_v28, %v719_v29 }
  0x88   : > { %v727_v31 = vrot.slane %v720_v4, %v1116_v8 }
  0x8a   : > { %v728_v0 = vcombine.high %v727_v31, %v727_v31 }
  0x8c   : > { %843 = vst.msk [vmem:[%s1238_s25 + $0x5] ss:$8 sm:$0xf] %vm1724_vm7, %v728_v0 }
  0x8d PF: > { %s14_s11 = sadd.s32 1, %s987_s11   ;;  %s1729_s6 = smov %s971_s7 }
  0x8e   : > { %p11_p9 = scmp.ge.s32.totalorder %s14_s11, 4   ;;  %s1730_s7 = smov %s975_s8 }
  0x8f   : > { %s1731_s8 = smov %s1053_s18  ;;  %s1732_s9 = smov %s983_s10 }
  0x90   : > { %s1733_s10 = smov %s1735_s13  ;;  %13 = sbr.rel (!%p11_p9) target bundleno = 4 (0x4), region = 69 }
  0x97   :  { %763 = vsyncpa [#allocation3], 1 }
  0x98   :  { %765 = vsyncpa [#allocation3 + $0x1], 1 }

</bundles_post_ra>
